<compile_context>
chip_gen: v6e
topology: v6e:2x2x1
jax: 0.10.0
libtpu: 0.0.40
codegen_flags: <defaults>
</compile_context>

<pallas_src>
import jax
import jax.numpy as jnp
from jax.experimental import pallas as pl
from jax.experimental.pallas import tpu as pltpu

BN_EPS = 1e-3      # nn.BatchNorm1d(eps=0.001)
VAR_EPS = 1e-4     # Encoder(var_eps=1e-4)


def _round_up(x, m):
    return ((x + m - 1) // m) * m


def encoder_kernel(x_ref, w0_ref, addin_ref, gamma_ref, beta_ref,
                   wh_ref, bh_ref, noise_ref, out_ref, acc_ref):
    k = pl.program_id(0)

    # --- init f32 accumulator on first K tile ---
    @pl.when(k == 0)
    def _():
        acc_ref[...] = jnp.zeros_like(acc_ref)

    # --- FCLayers Layer 0 Linear, K-tiled: acc += x_tile @ W0_tile (MXU, f32 acc) ---
    acc_ref[...] += jnp.dot(x_ref[...], w0_ref[...],
                            preferred_element_type=jnp.float32)

    # --- epilogue on the last K tile only: bias+cat, BN, ReLU, heads, sample ---
    @pl.when(k == pl.num_programs(0) - 1)
    def _():
        # bias + categorical-covariate embedding contribution (added exactly once)
        h = acc_ref[...] + addin_ref[...]                       # (B, n_hidden) f32

        # BatchNorm1d training-mode forward (batch stats, biased var), one pass,
        # affine folded into a single scale/shift.
        mean = jnp.mean(h, axis=0, keepdims=True)
        mean_sq = jnp.mean(h * h, axis=0, keepdims=True)
        var = mean_sq - mean * mean
        scale = gamma_ref[...] * jax.lax.rsqrt(var + BN_EPS)
        shift = beta_ref[...] - mean * scale
        h = jnp.maximum(h * scale + shift, 0.0)                 # BN + ReLU

        # TODO(synk): nn.Dropout(p=0.1) in training mode is stochastic w.r.t. torch
        # RNG; treated as identity here (eval semantics).

        # fused mean/var heads on the MXU: (B, n_hidden) @ (n_hidden, 2*n_out_pad)
        heads = jnp.dot(h.astype(wh_ref.dtype), wh_ref[...],
                        preferred_element_type=jnp.float32) + bh_ref[...]

        n_out_pad = noise_ref.shape[-1]
        q_m = heads[:, :n_out_pad]
        q_v = jnp.exp(heads[:, n_out_pad:]) + VAR_EPS
        # reparameterized sample: Normal(q_m, sqrt(q_v)).rsample()
        z = q_m + jnp.sqrt(q_v) * noise_ref[...]

        # lane-dense packed output slab: [ q_m | q_v | z ]
        out_ref[:, :n_out_pad] = q_m
        out_ref[:, n_out_pad:2 * n_out_pad] = q_v
        out_ref[:, 2 * n_out_pad:] = z


def encoder_forward(x, cat_idx, n_cat, params, noise, *,
                    tk=512, mxu_dtype=jnp.float32):
    """x: (B, n_input) f32, cat_idx: (B,) int32, noise: (B, n_output) f32.

    params: w0 (n_input, n_hidden), w0_cat (n_cat, n_hidden), b0 (1, n_hidden),
            gamma/beta (1, n_hidden), wm/wv (n_hidden, n_output), bm/bv (1, n_output).
    """
    del n_cat  # categories are handled via the w0_cat gather below
    B, n_input = x.shape
    n_hidden = params["w0"].shape[1]
    n_output = params["wm"].shape[1]
    n_out_pad = _round_up(max(n_output, 1), 128)

    # --- categorical covariate: one_hot(cat) @ W_cat is just a row gather;
    #     fold the Linear bias in as well so the kernel adds it exactly once. ---
    cat_contrib = jnp.take(params["w0_cat"], cat_idx, axis=0)        # (B, n_hidden)
    add_in = (cat_contrib + params["b0"]).astype(jnp.float32)

    # --- K (gene) tiling: pad to a multiple of the tile size (zeros contribute 0) ---
    tk = max(128, _round_up(tk, 128))
    tk = min(tk, _round_up(n_input, 128))
    k_pad = _round_up(n_input, tk)
    num_k = k_pad // tk
    x_pad = jnp.pad(x, ((0, 0), (0, k_pad - n_input))).astype(mxu_dtype)
    w0_pad = jnp.pad(params["w0"],
                     ((0, k_pad - n_input), (0, 0))).astype(mxu_dtype)

    # --- fused, lane-padded mean/var heads:  [ wm | 0 | wv | 0 ] ---
    w_heads = jnp.zeros((n_hidden, 2 * n_out_pad), jnp.float32)
    w_heads = w_heads.at[:, :n_output].set(params["wm"])
    w_heads = w_heads.at[:, n_out_pad:n_out_pad + n_output].set(params["wv"])
    w_heads = w_heads.astype(mxu_dtype)
    b_heads = jnp.zeros((1, 2 * n_out_pad), jnp.float32)
    b_heads = b_heads.at[:, :n_output].set(params["bm"])
    b_heads = b_heads.at[:, n_out_pad:n_out_pad + n_output].set(params["bv"])

    noise_pad = jnp.pad(noise, ((0, 0), (0, n_out_pad - n_output))
                        ).astype(jnp.float32)

    # --- compiler hints: scoped VMEM sized to the actual buffers + cost estimate ---
    mxu_itemsize = jnp.dtype(mxu_dtype).itemsize
    vmem_est = (
        2 * (B * tk + tk * n_hidden) * mxu_itemsize              # double-buffered K stream
        + 2 * (B * n_hidden + 2 * n_hidden + B * n_out_pad
               + n_hidden * 2 * n_out_pad + 2 * n_out_pad) * 4   # resident operands
        + B * n_hidden * 4                                       # accumulator scratch
        + 2 * B * 3 * n_out_pad * 4                              # output slab
        + (4 << 20)                                              # headroom
    )
    vmem_limit = int(min(max(vmem_est, 32 * 1024 * 1024), 64 * 1024 * 1024))
    flops = 2 * B * k_pad * n_hidden + 2 * B * n_hidden * 2 * n_out_pad \
        + 10 * B * n_hidden + 6 * B * n_out_pad
    transcendentals = 2 * B * n_out_pad + n_hidden
    bytes_accessed = ((B * k_pad + k_pad * n_hidden + n_hidden * 2 * n_out_pad)
                      * mxu_itemsize
                      + (B * n_hidden + 2 * n_hidden + 2 * n_out_pad
                         + B * n_out_pad) * 4
                      + B * 3 * n_out_pad * 4)

    out = pl.pallas_call(
        encoder_kernel,
        out_shape=jax.ShapeDtypeStruct((B, 3 * n_out_pad), jnp.float32),
        grid_spec=pltpu.PrefetchScalarGridSpec(
            num_scalar_prefetch=0,
            grid=(num_k,),
            in_specs=[
                pl.BlockSpec((B, tk), lambda k: (0, k)),              # x tile
                pl.BlockSpec((tk, n_hidden), lambda k: (k, 0)),       # W0 tile
                pl.BlockSpec((B, n_hidden), lambda k: (0, 0)),        # bias + cat embed
                pl.BlockSpec((1, n_hidden), lambda k: (0, 0)),        # gamma
                pl.BlockSpec((1, n_hidden), lambda k: (0, 0)),        # beta
                pl.BlockSpec((n_hidden, 2 * n_out_pad), lambda k: (0, 0)),  # fused heads W
                pl.BlockSpec((1, 2 * n_out_pad), lambda k: (0, 0)),   # fused heads b
                pl.BlockSpec((B, n_out_pad), lambda k: (0, 0)),       # noise
            ],
            out_specs=pl.BlockSpec((B, 3 * n_out_pad), lambda k: (0, 0)),
            scratch_shapes=[pltpu.VMEM((B, n_hidden), jnp.float32)],
        ),
        compiler_params=pltpu.CompilerParams(
            dimension_semantics=("arbitrary",),     # K is a reduction axis
            vmem_limit_bytes=vmem_limit,
        ),
        cost_estimate=pl.CostEstimate(
            flops=flops, transcendentals=transcendentals,
            bytes_accessed=bytes_accessed),
    )(x_pad, w0_pad, add_in, params["gamma"], params["beta"],
      w_heads, b_heads, noise_pad)

    q_m = out[:, :n_output]
    q_v = out[:, n_out_pad:n_out_pad + n_output]
    latent = out[:, 2 * n_out_pad:2 * n_out_pad + n_output]
    return q_m, q_v, latent


def init_params(key, n_input, n_cat, n_hidden, n_output):
    """Deterministic synthetic parameters (shapes match the PyTorch module)."""
    ks = jax.random.split(key, 7)
    n_in_total = n_input + n_cat
    s0 = 1.0 / jnp.sqrt(jnp.float32(n_in_total))
    s1 = 1.0 / jnp.sqrt(jnp.float32(n_hidden))
    return {
        # FCLayers Layer 0: Linear(n_input + n_cat, n_hidden), split gene / cat parts
        "w0": jax.random.uniform(ks[0], (n_input, n_hidden), jnp.float32, -s0, s0),
        "w0_cat": jax.random.uniform(ks[1], (n_cat, n_hidden), jnp.float32, -s0, s0),
        "b0": jax.random.uniform(ks[2], (1, n_hidden), jnp.float32, -s0, s0),
        # BatchNorm1d(n_hidden) affine params (PyTorch default: gamma=1, beta=0)
        "gamma": jnp.ones((1, n_hidden), jnp.float32),
        "beta": jnp.zeros((1, n_hidden), jnp.float32),
        # mean_encoder / var_encoder: Linear(n_hidden, n_output), stored (in, out)
        "wm": jax.random.uniform(ks[3], (n_hidden, n_output), jnp.float32, -s1, s1),
        "bm": jax.random.uniform(ks[4], (1, n_output), jnp.float32, -s1, s1),
        "wv": jax.random.uniform(ks[5], (n_hidden, n_output), jnp.float32, -s1, s1),
        "bv": jax.random.uniform(ks[6], (1, n_output), jnp.float32, -s1, s1),
    }


def reference_forward(x, cat_idx, n_cat, params, noise):
    """Pure-JAX reference matching the PyTorch Encoder forward (eval-mode dropout)."""
    one_hot = jax.nn.one_hot(cat_idx, n_cat, dtype=jnp.float32)
    x_cov = jnp.concatenate([x, one_hot], axis=-1)
    w0_full = jnp.concatenate([params["w0"], params["w0_cat"]], axis=0)
    h = x_cov @ w0_full + params["b0"]
    mean = jnp.mean(h, axis=0, keepdims=True)
    var = jnp.mean((h - mean) ** 2, axis=0, keepdims=True)
    h = (h - mean) / jnp.sqrt(var + BN_EPS) * params["gamma"] + params["beta"]
    h = jnp.maximum(h, 0.0)
    q_m = h @ params["wm"] + params["bm"]
    q_v = jnp.exp(h @ params["wv"] + params["bv"]) + VAR_EPS
    z = q_m + jnp.sqrt(q_v) * noise
    return q_m, q_v, z


if __name__ == "__main__":
    key = jax.random.PRNGKey(0)
    B, n_input, n_cat, n_hidden, n_output = 8, 16, 4, 32, 8

    k_x, k_cat, k_noise, k_params = jax.random.split(key, 4)
    x = jax.random.normal(k_x, (B, n_input), jnp.float32)
    cat_idx = jax.random.randint(k_cat, (B,), 0, n_cat, jnp.int32)
    noise = jax.random.normal(k_noise, (B, n_output), jnp.float32)  # eps for rsample
    params = init_params(k_params, n_input, n_cat, n_hidden, n_output)

    q_m, q_v, latent = encoder_forward(x, cat_idx, n_cat, params, noise)
    jax.block_until_ready((q_m, q_v, latent))

    assert q_m.shape == (B, n_output)
    assert q_v.shape == (B, n_output)
    assert latent.shape == (B, n_output)
    assert not bool(jnp.any(jnp.isnan(q_m)))
    assert not bool(jnp.any(jnp.isnan(q_v)))
    assert bool(jnp.all(q_v >= 0))

    # numerical check against the pure-JAX reference
    rq_m, rq_v, rz = reference_forward(x, cat_idx, n_cat, params, noise)
    assert bool(jnp.allclose(q_m, rq_m, rtol=5e-3, atol=5e-3))
    assert bool(jnp.allclose(q_v, rq_v, rtol=5e-3, atol=5e-3))
    assert bool(jnp.allclose(latent, rz, rtol=5e-3, atol=5e-3))

    print("KERNEL_OK")
</pallas_src>

<mosaic_0001>
module attributes {stable_mosaic.version = 11 : i64} {
  func.func @encoder_kernel(%arg0: i32, %arg1: memref<8x128xf32, #tpu.memory_space<vmem>>, %arg2: memref<128x32xf32, #tpu.memory_space<vmem>>, %arg3: memref<8x32xf32, #tpu.memory_space<vmem>>, %arg4: memref<1x32xf32, #tpu.memory_space<vmem>>, %arg5: memref<1x32xf32, #tpu.memory_space<vmem>>, %arg6: memref<32x256xf32, #tpu.memory_space<vmem>>, %arg7: memref<1x256xf32, #tpu.memory_space<vmem>>, %arg8: memref<8x128xf32, #tpu.memory_space<vmem>>, %arg9: memref<8x384xf32, #tpu.memory_space<vmem>>, %arg10: memref<8x32xf32, #tpu.memory_space<vmem>>) attributes {dimension_semantics = [#tpu.dimension_semantics<arbitrary>], iteration_bounds = array<i64: 1>, scalar_prefetch = 0 : i64, scratch_operands = 1 : i64, tpu.core_type = #tpu.core_type<tc>, window_params = [{transform_indices = @transform_0, window_bounds = array<i64: 8, 128>}, {transform_indices = @transform_1, window_bounds = array<i64: 128, 32>}, {pipeline_mode = #tpu.pipeline_mode<synchronous>, transform_indices = @transform_2, window_bounds = array<i64: 8, 32>}, {pipeline_mode = #tpu.pipeline_mode<synchronous>, transform_indices = @transform_3, window_bounds = array<i64: 1, 32>}, {pipeline_mode = #tpu.pipeline_mode<synchronous>, transform_indices = @transform_4, window_bounds = array<i64: 1, 32>}, {pipeline_mode = #tpu.pipeline_mode<synchronous>, transform_indices = @transform_5, window_bounds = array<i64: 32, 256>}, {pipeline_mode = #tpu.pipeline_mode<synchronous>, transform_indices = @transform_6, window_bounds = array<i64: 1, 256>}, {pipeline_mode = #tpu.pipeline_mode<synchronous>, transform_indices = @transform_7, window_bounds = array<i64: 8, 128>}, {pipeline_mode = #tpu.pipeline_mode<synchronous>, transform_indices = @transform_8, window_bounds = array<i64: 8, 384>}]} {
    %c0_i32 = arith.constant 0 : i32
    %0 = arith.cmpi eq, %arg0, %c0_i32 : i32
    %1 = arith.extui %0 : i1 to i32
    %c0_i32_0 = arith.constant 0 : i32
    %2 = arith.cmpi ne, %1, %c0_i32_0 : i32
    scf.if %2 {
      %cst_10 = arith.constant 0.000000e+00 : f32
      %12 = vector.broadcast %cst_10 : f32 to vector<8x32xf32>
      %c0_11 = arith.constant 0 : index
      %c0_12 = arith.constant 0 : index
      %13 = vector.load %arg10[%c0_11, %c0_12] : memref<8x32xf32, #tpu.memory_space<vmem>>, vector<8x32xf32>
      tpu.vector_store %arg10[%c0_11, %c0_12], %12 {strides = array<i32>} : memref<8x32xf32, #tpu.memory_space<vmem>>, vector<8x32xf32>,
    } else {
    }
    %c0 = arith.constant 0 : index
    %c0_1 = arith.constant 0 : index
    %3 = vector.load %arg10[%c0, %c0_1] : memref<8x32xf32, #tpu.memory_space<vmem>>, vector<8x32xf32>
    %c0_2 = arith.constant 0 : index
    %c0_3 = arith.constant 0 : index
    %4 = vector.load %arg1[%c0_2, %c0_3] : memref<8x128xf32, #tpu.memory_space<vmem>>, vector<8x128xf32>
    %c0_4 = arith.constant 0 : index
    %c0_5 = arith.constant 0 : index
    %5 = vector.load %arg2[%c0_4, %c0_5] : memref<128x32xf32, #tpu.memory_space<vmem>>, vector<128x32xf32>
    %cst = arith.constant dense<0.000000e+00> : vector<8x32xf32>
    %6 = tpu.matmul %4, %5, %cst {dimension_numbers = #tpu.dot_dimension_numbers<[1], [0], [0], [1], [0, 0, 1, 1], [], []>} : vector<8x128xf32>, vector<128x32xf32>, vector<8x32xf32> -> vector<8x32xf32>
    %7 = arith.addf %3, %6 : vector<8x32xf32>
    %c0_6 = arith.constant 0 : index
    %c0_7 = arith.constant 0 : index
    %8 = vector.load %arg10[%c0_6, %c0_7] : memref<8x32xf32, #tpu.memory_space<vmem>>, vector<8x32xf32>
    tpu.vector_store %arg10[%c0_6, %c0_7], %7 {strides = array<i32>} : memref<8x32xf32, #tpu.memory_space<vmem>>, vector<8x32xf32>,
    %c0_i32_8 = arith.constant 0 : i32
    %9 = arith.cmpi eq, %arg0, %c0_i32_8 : i32
    %10 = arith.extui %9 : i1 to i32
    %c0_i32_9 = arith.constant 0 : i32
    %11 = arith.cmpi ne, %10, %c0_i32_9 : i32
    scf.if %11 {
      %c0_10 = arith.constant 0 : index
      %c0_11 = arith.constant 0 : index
      %12 = vector.load %arg10[%c0_10, %c0_11] : memref<8x32xf32, #tpu.memory_space<vmem>>, vector<8x32xf32>
      %c0_12 = arith.constant 0 : index
      %c0_13 = arith.constant 0 : index
      %13 = vector.load %arg3[%c0_12, %c0_13] : memref<8x32xf32, #tpu.memory_space<vmem>>, vector<8x32xf32>
      %14 = arith.addf %12, %13 : vector<8x32xf32>
      %cst_14 = arith.constant dense<0.000000e+00> : vector<32xf32>
      %15 = vector.multi_reduction <add>, %14, %cst_14 [0] : vector<8x32xf32> to vector<32xf32>
      %16 = vector.shape_cast %15 : vector<32xf32> to vector<1x32xf32>
      %cst_15 = arith.constant 8.000000e+00 : f32
      %17 = vector.broadcast %cst_15 : f32 to vector<1x32xf32>
      %18 = arith.divf %16, %17 : vector<1x32xf32>
      %19 = arith.mulf %14, %14 : vector<8x32xf32>
      %cst_16 = arith.constant dense<0.000000e+00> : vector<32xf32>
      %20 = vector.multi_reduction <add>, %19, %cst_16 [0] : vector<8x32xf32> to vector<32xf32>
      %21 = vector.shape_cast %20 : vector<32xf32> to vector<1x32xf32>
      %cst_17 = arith.constant 8.000000e+00 : f32
      %22 = vector.broadcast %cst_17 : f32 to vector<1x32xf32>
      %23 = arith.divf %21, %22 : vector<1x32xf32>
      %24 = arith.mulf %18, %18 : vector<1x32xf32>
      %25 = arith.subf %23, %24 : vector<1x32xf32>
      %c0_18 = arith.constant 0 : index
      %c0_19 = arith.constant 0 : index
      %26 = vector.load %arg4[%c0_18, %c0_19] : memref<1x32xf32, #tpu.memory_space<vmem>>, vector<1x32xf32>
      %cst_20 = arith.constant 1.000000e-03 : f32
      %27 = vector.broadcast %cst_20 : f32 to vector<1x32xf32>
      %28 = arith.addf %25, %27 : vector<1x32xf32>
      %29 = math.rsqrt %28 : vector<1x32xf32>
      %30 = arith.mulf %26, %29 : vector<1x32xf32>
      %c0_21 = arith.constant 0 : index
      %c0_22 = arith.constant 0 : index
      %31 = vector.load %arg5[%c0_21, %c0_22] : memref<1x32xf32, #tpu.memory_space<vmem>>, vector<1x32xf32>
      %32 = arith.mulf %18, %30 : vector<1x32xf32>
      %33 = arith.subf %31, %32 : vector<1x32xf32>
      %34 = vector.broadcast %30 : vector<1x32xf32> to vector<8x32xf32>
      %35 = arith.mulf %14, %34 : vector<8x32xf32>
      %36 = vector.broadcast %33 : vector<1x32xf32> to vector<8x32xf32>
      %37 = arith.addf %35, %36 : vector<8x32xf32>
      %cst_23 = arith.constant 0.000000e+00 : f32
      %38 = vector.broadcast %cst_23 : f32 to vector<8x32xf32>
      %39 = arith.maximumf %37, %38 : vector<8x32xf32>
      %c0_24 = arith.constant 0 : index
      %c0_25 = arith.constant 0 : index
      %40 = vector.load %arg6[%c0_24, %c0_25] : memref<32x256xf32, #tpu.memory_space<vmem>>, vector<32x256xf32>
      %cst_26 = arith.constant dense<0.000000e+00> : vector<8x256xf32>
      %41 = tpu.matmul %39, %40, %cst_26 {dimension_numbers = #tpu.dot_dimension_numbers<[1], [0], [0], [1], [0, 0, 1, 1], [], []>} : vector<8x32xf32>, vector<32x256xf32>, vector<8x256xf32> -> vector<8x256xf32>
      %c0_27 = arith.constant 0 : index
      %c0_28 = arith.constant 0 : index
      %42 = vector.load %arg7[%c0_27, %c0_28] : memref<1x256xf32, #tpu.memory_space<vmem>>, vector<1x256xf32>
      %43 = vector.broadcast %42 : vector<1x256xf32> to vector<8x256xf32>
      %44 = arith.addf %41, %43 : vector<8x256xf32>
      %45 = vector.extract_strided_slice %44 {offsets = [0, 0], sizes = [8, 128], strides = [1, 1]} : vector<8x256xf32> to vector<8x128xf32>
      %46 = vector.extract_strided_slice %44 {offsets = [0, 128], sizes = [8, 128], strides = [1, 1]} : vector<8x256xf32> to vector<8x128xf32>
      %47 = math.exp %46 : vector<8x128xf32>
      %cst_29 = arith.constant 9.99999974E-5 : f32
      %48 = vector.broadcast %cst_29 : f32 to vector<8x128xf32>
      %49 = arith.addf %47, %48 : vector<8x128xf32>
      %50 = math.sqrt %49 : vector<8x128xf32>
      %c0_30 = arith.constant 0 : index
      %c0_31 = arith.constant 0 : index
      %51 = vector.load %arg8[%c0_30, %c0_31] : memref<8x128xf32, #tpu.memory_space<vmem>>, vector<8x128xf32>
      %52 = arith.mulf %50, %51 : vector<8x128xf32>
      %53 = arith.addf %45, %52 : vector<8x128xf32>
      %c0_32 = arith.constant 0 : index
      %c0_33 = arith.constant 0 : index
      %54 = vector.load %arg9[%c0_32, %c0_33] : memref<8x384xf32, #tpu.memory_space<vmem>>, vector<8x128xf32>
      tpu.vector_store %arg9[%c0_32, %c0_33], %45 {strides = array<i32>} : memref<8x384xf32, #tpu.memory_space<vmem>>, vector<8x128xf32>,
      %c0_34 = arith.constant 0 : index
      %c128 = arith.constant 128 : index
      %55 = vector.load %arg9[%c0_34, %c128] : memref<8x384xf32, #tpu.memory_space<vmem>>, vector<8x128xf32>
      tpu.vector_store %arg9[%c0_34, %c128], %49 {strides = array<i32>} : memref<8x384xf32, #tpu.memory_space<vmem>>, vector<8x128xf32>,
      %c0_35 = arith.constant 0 : index
      %c256 = arith.constant 256 : index
      %56 = vector.load %arg9[%c0_35, %c256] : memref<8x384xf32, #tpu.memory_space<vmem>>, vector<8x128xf32>
      tpu.vector_store %arg9[%c0_35, %c256], %53 {strides = array<i32>} : memref<8x384xf32, #tpu.memory_space<vmem>>, vector<8x128xf32>,
    } else {
    }
    return
  }
  func.func @transform_0(%arg0: i32) -> (i32, i32) {
    %c0_i32 = arith.constant 0 : i32
    %c0_i32_0 = arith.constant 0 : i32
    return %c0_i32, %arg0 : i32, i32
  }
  func.func @transform_1(%arg0: i32) -> (i32, i32) {
    %c0_i32 = arith.constant 0 : i32
    %c0_i32_0 = arith.constant 0 : i32
    return %arg0, %c0_i32 : i32, i32
  }
  func.func @transform_2(%arg0: i32) -> (i32, i32) {
    %c0_i32 = arith.constant 0 : i32
    %c0_i32_0 = arith.constant 0 : i32
    %c0_i32_1 = arith.constant 0 : i32
    return %c0_i32, %c0_i32_0 : i32, i32
  }
  func.func @transform_3(%arg0: i32) -> (i32, i32) {
    %c0_i32 = arith.constant 0 : i32
    %c0_i32_0 = arith.constant 0 : i32
    %c0_i32_1 = arith.constant 0 : i32
    return %c0_i32, %c0_i32_0 : i32, i32
  }
  func.func @transform_4(%arg0: i32) -> (i32, i32) {
    %c0_i32 = arith.constant 0 : i32
    %c0_i32_0 = arith.constant 0 : i32
    %c0_i32_1 = arith.constant 0 : i32
    return %c0_i32, %c0_i32_0 : i32, i32
  }
  func.func @transform_5(%arg0: i32) -> (i32, i32) {
    %c0_i32 = arith.constant 0 : i32
    %c0_i32_0 = arith.constant 0 : i32
    %c0_i32_1 = arith.constant 0 : i32
    return %c0_i32, %c0_i32_0 : i32, i32
  }
  func.func @transform_6(%arg0: i32) -> (i32, i32) {
    %c0_i32 = arith.constant 0 : i32
    %c0_i32_0 = arith.constant 0 : i32
    %c0_i32_1 = arith.constant 0 : i32
    return %c0_i32, %c0_i32_0 : i32, i32
  }
  func.func @transform_7(%arg0: i32) -> (i32, i32) {
    %c0_i32 = arith.constant 0 : i32
    %c0_i32_0 = arith.constant 0 : i32
    %c0_i32_1 = arith.constant 0 : i32
    return %c0_i32, %c0_i32_0 : i32, i32
  }
  func.func @transform_8(%arg0: i32) -> (i32, i32) {
    %c0_i32 = arith.constant 0 : i32
    %c0_i32_0 = arith.constant 0 : i32
    %c0_i32_1 = arith.constant 0 : i32
    return %c0_i32, %c0_i32_0 : i32, i32
  }
}

</mosaic_0001>

<bundles_post_ra>
// kernel: tpu_custom_call.1
= control target key start
LH: loop header
LB: loop body
LE: loop exit
PB: predicated region body
PF: predicated region fallthrough
CT: control target
= control target key end

     0   :  { %vm34_vm0 = vcmask 261120   ;;  %v383_v1 = vmov 0.0   ;;  %vm384_vm1 = vmmov 0   ;;  %s529_s0 = inlined_call_operand.vmem [shape: f32[8,128], index: 0, kind: input, shape index: {}]   ;;  %s530_s1 = inlined_call_operand.vmem [shape: f32[128,32], index: 1, kind: input, shape index: {}]   ;;  %s531_s2 = inlined_call_operand.vmem [shape: f32[8,32], index: 2, kind: input, shape index: {}]   ;;  %s532_s3 = inlined_call_operand.vmem [shape: f32[1,32], index: 3, kind: input, shape index: {}]   ;;  %s533_s4 = inlined_call_operand.vmem [shape: f32[1,32], index: 4, kind: input, shape index: {}]   ;;  %s534_s5 = inlined_call_operand.vmem [shape: f32[32,256], index: 5, kind: input, shape index: {}]   ;;  %s535_s6 = inlined_call_operand.vmem [shape: f32[1,256], index: 6, kind: input, shape index: {}]   ;;  %s536_s7 = inlined_call_operand.vmem [shape: f32[8,128], index: 7, kind: input, shape index: {}]   ;;  %s537_s8 = inlined_call_operand.hbm [shape: f32[8,384], index: 8, kind: output, shape index: {}]  }
   0x1   :  { %v53_v0 = vld [vmem:[%s530_s1 + $0x78] sm:$0xff]  ;;  %317 = vmatprep.subr.mxu0 %v383_v1  ;;  %v52_v2 = vld [vmem:[%s530_s1 + $0x70] sm:$0xff]  ;;  %349 = vmatprep.mubr.msk.f32.mxu0 %vm384_vm1, %v383_v1  ;;  %35 = vst.msk [vmem:[#allocation2] sm:$0xff] %vm34_vm0, %v383_v1  ;;  %v51_v3 = vld [vmem:[%s530_s1 + $0x68] sm:$0xff] }
   0x2   :  { %318 = vmatpush3.msra.mxu0 %v53_v0  ;;  %262 = vmatprep.mubr.f32.mxu1 %v383_v1  ;;  %v50_v4 = vld [vmem:[%s530_s1 + $0x60] sm:$0xff] }
   0x3   :  { %319 = vmatprep.subr.mxu0 %v383_v1 }
   0x4   :  { %320 = vmatpush3.msra.mxu0 %v52_v2 }
   0x5   :  { %321 = vmatprep.subr.mxu0 %v383_v1 }
   0x6   :  { %13 = vsyncpa [#allocation4], 0  ;;  %322 = vmatpush3.msra.mxu0 %v51_v3  ;;  %v49_v5 = vld [vmem:[%s530_s1 + $0x58] sm:$0xff]  ;;  %v48_v6 = vld [vmem:[%s530_s1 + $0x50] sm:$0xff]  ;;  %v161_v53 = vlaneseq }
   0x7   :  { %323 = vmatprep.subr.mxu0 %v383_v1  ;;  %v47_v7 = vld [vmem:[%s530_s1 + $0x48] sm:$0xff]  ;;  %v46_v8 = vld [vmem:[%s530_s1 + $0x40] sm:$0xff]  ;;  %v45_v9 = vld [vmem:[%s530_s1 + $0x38] sm:$0xff] }
   0x8   :  { %324 = vmatpush3.msra.mxu0 %v50_v4  ;;  %v44_v10 = vld [vmem:[%s530_s1 + $0x30] sm:$0xff]  ;;  %v43_v11 = vld [vmem:[%s530_s1 + $0x28] sm:$0xff]  ;;  %v42_v12 = vld [vmem:[%s530_s1 + $0x20] sm:$0xff]  ;;  %v162_v54 = vshrl.u32 %v161_v53, 7 }
   0x9   :  { %325 = vmatprep.subr.mxu0 %v383_v1  ;;  %v41_v13 = vld [vmem:[%s530_s1 + $0x18] sm:$0xff]  ;;  %v40_v14 = vld [vmem:[%s530_s1 + $0x10] sm:$0xff]  ;;  %v39_v15 = vld [vmem:[%s530_s1 + $0x8] sm:$0xff] }
   0xa   :  { %326 = vmatpush3.msra.mxu0 %v49_v5  ;;  %v38_v16 = vld [vmem:[%s530_s1] sm:$0xff]  ;;  %v182_v18 = vld [vmem:[%s534_s5 + $0x38] sm:$0xff]  ;;  %v181_v19 = vld [vmem:[%s534_s5 + $0x30] sm:$0xff]  ;;  %v163_v56 = vsub.s32 0, %v162_v54  ;;  %v191_v4 = vsub.s32 1, %v162_v54 }
   0xb   :  { %327 = vmatprep.subr.mxu0 %v383_v1  ;;  %v37_v17 = vld [vmem:[%s529_s0] sm:$0xff]  ;;  %v180_v20 = vld [vmem:[%s534_s5 + $0x28] sm:$0xff]  ;;  %222 = vmatprep.subr.mxu1 %v182_v18  ;;  %v178_v22 = vld [vmem:[%s534_s5 + $0x18] sm:$0xff] }
   0xc   :  { %328 = vmatpush3.msra.mxu0 %v48_v6  ;;  %v179_v21 = vld [vmem:[%s534_s5 + $0x20] sm:$0xff]  ;;  %223 = vmatpush1.msra.mxu1 %v181_v19  ;;  %v177_v23 = vld [vmem:[%s534_s5 + $0x10] sm:$0xff]  ;;  %v176_v24 = vld [vmem:[%s534_s5 + $0x8] sm:$0xff] }
   0xd   :  { %329 = vmatprep.subr.mxu0 %v383_v1  ;;  %224 = vmatprep.subr.mxu1 %v180_v20  ;;  %v175_v25 = vld [vmem:[%s534_s5] sm:$0xff] }
   0xe   :  { %330 = vmatpush3.msra.mxu0 %v47_v7  ;;  %225 = vmatpush1.msra.mxu1 %v179_v21  ;;  %v36_v26 = vld [vmem:[#allocation2] sm:$0xff] }
   0xf   :  { %331 = vmatprep.subr.mxu0 %v383_v1  ;;  %226 = vmatprep.subr.mxu1 %v178_v22  ;;  %v131_v30 = vld [vmem:[%s531_s2] sm:$0xff] }
  0x10   :  { %332 = vmatpush3.msra.mxu0 %v46_v8  ;;  %227 = vmatpush1.msra.mxu1 %v177_v23  ;;  %v153_v55 = vld [vmem:[%s532_s3] sm:$0x1] }
  0x11   :  { %333 = vmatprep.subr.mxu0 %v383_v1  ;;  %228 = vmatprep.subr.mxu1 %v176_v24  ;;  %v157_v59 = vld [vmem:[%s533_s4] sm:$0x1] }
  0x12   :  { %334 = vmatpush3.msra.mxu0 %v45_v9  ;;  %229 = vmatpush1.msra.mxu1 %v175_v25  ;;  %v183_v3 = vld [vmem:[%s535_s6] sm:$0x3]  ;;  %s385_s6 = smov [#allocation3]  }
  0x13   :  { %335 = vmatprep.subr.mxu0 %v383_v1  ;;  %v188_v5 = vrot.slane %v183_v3, %v163_v56  ;;  %v192_v6 = vrot.slane %v183_v3, %v191_v4  ;;  %s291_s15 = sshll.u32 %s385_s6, 4  ;;  %s292_s15 = int_to_ptr.vmem [resolvable:$true] %s291_s15 }
  0x14   :  { %336 = vmatpush3.msra.mxu0 %v44_v10  ;;  %s361_s16 = scalar_lea.vmem %s292_s15, 384  ;;  %p366_p1 = scmp.lt.s32.totalorder %s292_s15, %s292_s15 }
  0x15   :  { %337 = vmatprep.subr.mxu0 %v383_v1  ;;  %p362_p0 = scmp.ne.s32.totalorder %s292_s15, %s361_s16  ;;  %p367_p2 = scmp.lt.s32.totalorder %s361_s16, %s361_s16 }
  0x16   :  { %338 = vmatpush3.msra.mxu0 %v43_v11 }
  0x17   :  { %339 = vmatprep.subr.mxu0 %v383_v1  ;;  %p368_p3 = por %p367_p2, %p366_p1 }
  0x18   :  { %340 = vmatpush3.msra.mxu0 %v42_v12 }
  0x19   :  { %341 = vmatprep.subr.mxu0 %v383_v1  ;;  %p369_p4 = pnand %p368_p3, %p362_p0 }
  0x1a   :  { %342 = vmatpush3.msra.mxu0 %v41_v13 }
  0x1b   :  { %343 = vmatprep.subr.mxu0 %v383_v1 }
  0x1c   :  { %344 = vmatpush3.msra.mxu0 %v40_v14 }
  0x1d   :  { %345 = vmatprep.subr.mxu0 %v383_v1 }
  0x1e   :  { %346 = vmatpush3.msra.mxu0 %v39_v15 }
  0x1f   :  { %347 = vmatprep.subr.mxu0 %v383_v1 }
  0x20   :  { %348 = vmatpush3.msra.mxu0 %v38_v16 }
  0x21   :  { %350 = vmatmul.mubr.f32.vlgmr.msra.gmra.mxu0 %v37_v17  ;;  %v279_v17 = vld [vmem:[%s536_s7] sm:$0xff] }
  0xe1   :  { %v120_v27 = vpop.f32.mrf.mxu0 }
  0xe2   :  { %v124_v28 = vadd.f32 %v120_v27, %v36_v26 }
  0xe3   :  { %v351_v29 = vpop.f32.mrf.mxu0 }
  0xe4   :  { %126 = vst.msk [vmem:[#allocation2] sm:$0xff] %vm34_vm0, %v124_v28 }
  0xeb   :  { %v130_v31 = vld [vmem:[#allocation2] sm:$0xff] }
  0xec   :  { %v132_v32 = vadd.f32 %v131_v30, %v130_v31 }
  0xee   :  { %v133_v33 = vsel %vm34_vm0, %v132_v32, 0.0  ;;  %v142_v34 = vmul.f32 %v132_v32, %v132_v32 }
  0xef   :  { %v134_v35 = vrot.slane %v133_v33, 4 }
  0xf0   :  { %v143_v36 = vsel %vm34_vm0, %v142_v34, 0.0 }
  0xf1   :  { %v135_v37 = vadd.f32 %v134_v35, %v133_v33  ;;  %v144_v38 = vrot.slane %v143_v36, 4 }
  0xf3   :  { %v136_v39 = vrot.slane %v135_v37, 2  ;;  %v145_v40 = vadd.f32 %v144_v38, %v143_v36 }
  0xf5   :  { %v137_v41 = vadd.f32 %v136_v39, %v135_v37  ;;  %v146_v42 = vrot.slane %v145_v40, 2 }
  0xf7   :  { %v138_v43 = vrot.slane %v137_v41, 1  ;;  %v147_v44 = vadd.f32 %v146_v42, %v145_v40 }
  0xf9   :  { %v139_v45 = vadd.f32 %v138_v43, %v137_v41  ;;  %v148_v46 = vrot.slane %v147_v44, 1 }
  0xfb   :  { %v141_v47 = vmul.f32 0.125, %v139_v45  ;;  %v149_v48 = vadd.f32 %v148_v46, %v147_v44 }
  0xfd   :  { %v150_v49 = vmul.f32 0.125, %v149_v48  ;;  %v151_v50 = vmul.f32 %v141_v47, %v141_v47 }
  0xff   :  { %v152_v51 = vsub.f32 %v150_v49, %v151_v50 }
 0x101   :  { %v154_v52 = vadd.f32 0.001, %v152_v51 }
 0x103   :  { %355 = vrsqrt.f32 %v154_v52 }
 0x110   :  { %v356_v57 = vpop.eup %355 }
 0x111   :  { %v156_v58 = vmul.f32 %v356_v57, %v153_v55 }
 0x113   :  { %v158_v60 = vmul.f32 %v156_v58, %v141_v47  ;;  %v164_v61 = vrot.slane %v156_v58, %v163_v56 }
 0x115   :  { %v159_v62 = vsub.f32 %v157_v59, %v158_v60  ;;  %v166_v63 = vmul.f32 %v164_v61, %v132_v32 }
 0x117   :  { %v171_v0 = vrot.slane %v159_v62, %v163_v56 }
 0x119   :  { %v173_v1 = vadd.f32 %v171_v0, %v166_v63 }
 0x11b   :  { %v174_v2 = vmax.f32 %v173_v1, 0.0 }
 0x11d   :  { %299 = vmatmul.mubr.msk.f32.vlgmr.msra.gmra.mxu1 %vm34_vm0, %v174_v2 }
 0x1dd   :  { %v264_v7 = vpop.f32.mrf.mxu1 }
 0x1de   :  { %v265_v8 = vadd.f32 %v264_v7, %v188_v5 }
 0x1df   :  { %v266_v9 = vpop.f32.mrf.mxu1 }
 0x1e0   :  { %282 = vst [vmem:[#allocation3] sm:$0xff] %v265_v8  ;;  %v267_v10 = vadd.f32 %v266_v9, %v192_v6 }
 0x1e2   :  { %v269_v11 = vmul.f32 1.442695, %v267_v10 }
 0x1e4   :  { %357 = vpow2.f32 %v269_v11 }
 0x1f1   :  { %v358_v12 = vpop.eup %357 }
 0x1f2   :  { %v271_v13 = vadd.f32 0.0001, %v358_v12 }
 0x1f4   :  { %359 = vrsqrt.f32 %v271_v13  ;;  %283 = vst [vmem:[#allocation3 + $0x8] sm:$0xff] %v271_v13  ;;  %vm274_vm2 = vcmp.eq.f32.partialorder %v271_v13, inf  ;;  %v277_v16 = vand.u32 2147483648, %v271_v13  ;;  %vm276_vm3 = vcmp.eq.f32.partialorder %v271_v13, 0.0 }
 0x201   :  { %v360_v14 = vpop.eup %359 }
 0x202   :  { %v273_v15 = vmul.f32 %v360_v14, %v271_v13 }
 0x204   :  { %v275_v18 = vsel %vm274_vm2, %v271_v13, %v273_v15 }
 0x205   :  { %v278_v19 = vsel %vm276_vm3, %v277_v16, %v275_v18 }
 0x206   :  { %v280_v20 = vmul.f32 %v279_v17, %v278_v19 }
 0x208   :  { %v281_v21 = vadd.f32 %v280_v20, %v265_v8 }
 0x20a   :  { %284 = vst [vmem:[#allocation3 + $0x10] sm:$0xff] %v281_v21 }
 0x20b   :  { %372 = shalt.err (!%p369_p4)
}
 0x20c   :  { %294 = dma.vmem_to_hbm [thread:$0]  %s292_s15, 384, %s537_s8, [#allocation4]  }
 0x20d   :  { %381 = dma.done.wait [#allocation4], 384  }
 0x20e   :  { %382 = vsyncadd [#allocation4], 4294966912 }
 0x20f   :  { %298 = vsyncpa [#allocation4], 1 }

</bundles_post_ra>
